<compile_context>
chip_gen: v7x
topology: tpu7x:2x2x1
jax: 0.10.0
libtpu: 0.0.40
codegen_flags: <defaults>
</compile_context>

<pallas_src>
import functools

import jax
import jax.numpy as jnp
from jax.experimental import pallas as pl
from jax.experimental.pallas import tpu as pltpu


def _tv_tile_kernel(x_ref, out_ref, *, img_h, total_rows):
    """Partial TV sums for one (tile_rows, W) slab of the flattened (B*C*H, W) view.

    x_ref  : VMEM tile of shape (tile_rows, W)
    out_ref: VMEM tile of shape (1, 8, 128); lane 0 <- sum(h_diff^2), lane 1 <- sum(w_diff^2)
    """
    t = pl.program_id(0)
    x = x_ref[...].astype(jnp.float32)                 # (TR, W)
    tr = x.shape[0]

    # Global row index (into the flattened B*C*H axis) of every row in this tile.
    r = jax.lax.broadcasted_iota(jnp.int32, (tr, 1), 0)
    gr = t * tr + r                                    # (TR, 1)

    # ---- vertical (H) differences: pair (row g, row g+1) entirely inside the tile.
    hd = x[1:, :] - x[:-1, :]                          # (TR-1, W)
    hi = gr[1:, :]                                     # global index of the upper row of each pair
    # Valid iff the upper row is not the first row of a channel (no cross-channel /
    # cross-batch diffs) and is a real (non-padded) row.
    h_valid = (hi % img_h != 0) & (hi < total_rows)    # (TR-1, 1), broadcasts over W
    h_sum = jnp.sum(jnp.where(h_valid, hd * hd, 0.0))

    # ---- horizontal (W) differences.
    wd = x[:, 1:] - x[:, :-1]                          # (TR, W-1)
    row_real = gr < total_rows                         # mask padded rows of the last tile
    w_sum = jnp.sum(jnp.where(row_real, wd * wd, 0.0))

    # Lane-dense (8, 128) partial-sum block -> full unmasked vector store.
    lane = jax.lax.broadcasted_iota(jnp.int32, (8, 128), 1)
    out_ref[0] = jnp.where(lane == 0, h_sum, jnp.where(lane == 1, w_sum, 0.0))


def tv_loss(x, tv_loss_weight=1.0, *, target_block_bytes=4 * 1024 * 1024):
    """Pallas TPU implementation of TVLoss.forward for NCHW input."""
    B, C, H, W = x.shape
    total_rows = B * C * H
    x2d = x.reshape(total_rows, W)                     # free reshape (contiguous)

    itemsize = jnp.dtype(x.dtype).itemsize
    row_bytes = max(1, W * itemsize)
    tr = max(1, int(target_block_bytes) // row_bytes)
    tr = min(tr, total_rows)
    tr = max(8, (tr // 8) * 8)                         # sublane-aligned tile height (>= 8)
    n_tiles = (total_rows + tr - 1) // tr

    # Explicit VMEM budget: double-buffered input block + f32 working copies.
    blk_in = tr * W * itemsize
    blk_f32 = tr * W * 4
    vmem_limit = int(min(128 * 1024 * 1024,
                         max(32 * 1024 * 1024, 2 * blk_in + 5 * blk_f32 + (2 << 20))))

    kernel = functools.partial(_tv_tile_kernel, img_h=H, total_rows=total_rows)

    cost = pl.CostEstimate(
        flops=6 * total_rows * W,
        transcendentals=0,
        bytes_accessed=total_rows * W * itemsize + n_tiles * 8 * 128 * 4,
    )

    partials = pl.pallas_call(
        kernel,
        out_shape=jax.ShapeDtypeStruct((n_tiles, 8, 128), jnp.float32),
        grid_spec=pltpu.PrefetchScalarGridSpec(
            num_scalar_prefetch=0,
            grid=(n_tiles,),
            in_specs=[pl.BlockSpec((tr, W), lambda t: (t, 0))],
            out_specs=pl.BlockSpec((1, 8, 128), lambda t: (t, 0, 0)),
        ),
        compiler_params=pltpu.CompilerParams(
            dimension_semantics=("parallel",),         # no cross-step deps -> megacore-shardable
            vmem_limit_bytes=vmem_limit,
        ),
        cost_estimate=cost,
    )(x2d)

    h_tv = jnp.sum(partials[:, 0, 0])
    w_tv = jnp.sum(partials[:, 0, 1])

    # Vertical pairs that straddle a tile boundary (a handful of rows): pure JAX.
    if n_tiles > 1:
        g = jnp.arange(1, n_tiles) * tr                # global row of the upper element of each pair
        valid = (g % H) != 0                           # skip channel/batch boundaries
        d = (x2d[g, :] - x2d[g - 1, :]).astype(jnp.float32)
        h_tv = h_tv + jnp.sum(jnp.where(valid[:, None], d * d, 0.0))

    count_h = C * (H - 1) * W
    count_w = C * H * (W - 1)
    # TODO(synk): H == 1 or W == 1 makes count_h/count_w zero (inf/NaN) — same behavior as the PyTorch module.
    return tv_loss_weight * 2.0 * (h_tv / count_h + w_tv / count_w) / B


def tv_loss_ref(x, tv_loss_weight=1.0):
    """Pure-JAX reference mirroring the PyTorch module."""
    B, C, H, W = x.shape
    count_h = C * (H - 1) * W
    count_w = C * H * (W - 1)
    h_tv = jnp.sum((x[:, :, 1:, :] - x[:, :, : H - 1, :]) ** 2)
    w_tv = jnp.sum((x[:, :, :, 1:] - x[:, :, :, : W - 1]) ** 2)
    return tv_loss_weight * 2.0 * (h_tv / count_h + w_tv / count_w) / B


if __name__ == "__main__":
    key = jax.random.PRNGKey(0)
    x = jax.random.normal(key, (2, 4, 16, 16), dtype=jnp.float32)  # NCHW

    ref = jax.block_until_ready(tv_loss_ref(x, tv_loss_weight=1.0))

    # Single-tile path (whole problem fits one grid step).
    out = jax.block_until_ready(tv_loss(x, tv_loss_weight=1.0))
    assert jnp.allclose(out, ref, rtol=1e-5, atol=1e-5), (out, ref)

    # Multi-tile path (forces several row tiles, a padded last tile, and the
    # wrapper-side tile-boundary correction).
    out_tiled = jax.block_until_ready(
        tv_loss(x, tv_loss_weight=1.0, target_block_bytes=1536))
    assert jnp.allclose(out_tiled, ref, rtol=1e-5, atol=1e-5), (out_tiled, ref)

    print("KERNEL_OK")
</pallas_src>

<mosaic_0001>
module attributes {stable_mosaic.version = 11 : i64} {
  func.func @_tv_tile_kernel(%arg0: i32, %arg1: memref<128x16xf32, #tpu.memory_space<vmem>>, %arg2: memref<1x8x128xf32, #tpu.memory_space<vmem>>) attributes {dimension_semantics = [#tpu.dimension_semantics<parallel>], iteration_bounds = array<i64: 1>, scalar_prefetch = 0 : i64, scratch_operands = 0 : i64, tpu.core_type = #tpu.core_type<tc>, window_params = [{transform_indices = @transform_0, window_bounds = array<i64: 128, 16>}, {transform_indices = @transform_1, window_bounds = array<i64: 1, 8, 128>}]} {
    %c0 = arith.constant 0 : index
    %c0_0 = arith.constant 0 : index
    %0 = vector.load %arg1[%c0, %c0_0] : memref<128x16xf32, #tpu.memory_space<vmem>>, vector<128x16xf32>
    %1 = tpu.iota {dimensions = array<i32: 0>} : vector<128x1xi32>
    %c128_i32 = arith.constant 128 : i32
    %2 = arith.muli %arg0, %c128_i32 : i32
    %3 = vector.broadcast %2 : i32 to vector<128x1xi32>
    %4 = arith.addi %3, %1 : vector<128x1xi32>
    %5 = vector.extract_strided_slice %0 {offsets = [1, 0], sizes = [127, 16], strides = [1, 1]} : vector<128x16xf32> to vector<127x16xf32>
    %6 = vector.extract_strided_slice %0 {offsets = [0, 0], sizes = [127, 16], strides = [1, 1]} : vector<128x16xf32> to vector<127x16xf32>
    %7 = arith.subf %5, %6 : vector<127x16xf32>
    %8 = vector.extract_strided_slice %4 {offsets = [1, 0], sizes = [127, 1], strides = [1, 1]} : vector<128x1xi32> to vector<127x1xi32>
    %c16_i32 = arith.constant 16 : i32
    %c0_i32 = arith.constant 0 : i32
    %9 = arith.cmpi eq, %c16_i32, %c0_i32 : i32
    %c1_i32 = arith.constant 1 : i32
    %10 = arith.select %9, %c1_i32, %c16_i32 : i32
    %11 = vector.broadcast %10 : i32 to vector<127x1xi32>
    %12 = arith.remsi %8, %11 : vector<127x1xi32>
    %c0_i32_1 = arith.constant 0 : i32
    %13 = vector.broadcast %c0_i32_1 : i32 to vector<127x1xi32>
    %14 = arith.cmpi ne, %12, %13 : vector<127x1xi32>
    %c0_i32_2 = arith.constant 0 : i32
    %15 = vector.broadcast %c0_i32_2 : i32 to vector<127x1xi32>
    %16 = arith.cmpi slt, %12, %15 : vector<127x1xi32>
    %c0_i32_3 = arith.constant 0 : i32
    %17 = arith.cmpi slt, %10, %c0_i32_3 : i32
    %18 = vector.broadcast %17 : i1 to vector<127x1xi1>
    %19 = vector.broadcast %18 : vector<127x1xi1> to vector<127x1xi1>
    %20 = arith.xori %16, %19 : vector<127x1xi1>
    %21 = arith.andi %20, %14 : vector<127x1xi1>
    %22 = vector.broadcast %10 : i32 to vector<127x1xi32>
    %23 = arith.addi %12, %22 : vector<127x1xi32>
    %24 = arith.select %21, %23, %12 : vector<127x1xi1>, vector<127x1xi32>
    %c0_i32_4 = arith.constant 0 : i32
    %25 = vector.broadcast %c0_i32_4 : i32 to vector<127x1xi32>
    %26 = arith.cmpi ne, %24, %25 : vector<127x1xi32>
    %c128_i32_5 = arith.constant 128 : i32
    %27 = vector.broadcast %c128_i32_5 : i32 to vector<127x1xi32>
    %28 = arith.cmpi slt, %8, %27 : vector<127x1xi32>
    %29 = arith.andi %26, %28 : vector<127x1xi1>
    %30 = arith.mulf %7, %7 : vector<127x16xf32>
    %cst = arith.constant 0.000000e+00 : f32
    %31 = vector.shape_cast %29 : vector<127x1xi1> to vector<127x1xi1>
    %32 = vector.broadcast %31 : vector<127x1xi1> to vector<127x16xi1>
    %33 = vector.broadcast %cst : f32 to vector<127x16xf32>
    %34 = arith.select %32, %30, %33 : vector<127x16xi1>, vector<127x16xf32>
    %35 = vector.shape_cast %34 : vector<127x16xf32> to vector<1x127x16xf32>
    %cst_6 = arith.constant dense<0.000000e+00> : vector<1xf32>
    %36 = vector.multi_reduction <add>, %35, %cst_6 [1, 2] : vector<1x127x16xf32> to vector<1xf32>
    %37 = vector.shape_cast %36 : vector<1xf32> to vector<1x1x1xf32>
    %38 = vector.extract %37[0, 0, 0] : f32 from vector<1x1x1xf32>
    %39 = vector.extract_strided_slice %0 {offsets = [0, 1], sizes = [128, 15], strides = [1, 1]} : vector<128x16xf32> to vector<128x15xf32>
    %40 = vector.extract_strided_slice %0 {offsets = [0, 0], sizes = [128, 15], strides = [1, 1]} : vector<128x16xf32> to vector<128x15xf32>
    %41 = arith.subf %39, %40 : vector<128x15xf32>
    %c128_i32_7 = arith.constant 128 : i32
    %42 = vector.broadcast %c128_i32_7 : i32 to vector<128x1xi32>
    %43 = arith.cmpi slt, %4, %42 : vector<128x1xi32>
    %44 = arith.mulf %41, %41 : vector<128x15xf32>
    %cst_8 = arith.constant 0.000000e+00 : f32
    %45 = vector.shape_cast %43 : vector<128x1xi1> to vector<128x1xi1>
    %46 = vector.broadcast %45 : vector<128x1xi1> to vector<128x15xi1>
    %47 = vector.broadcast %cst_8 : f32 to vector<128x15xf32>
    %48 = arith.select %46, %44, %47 : vector<128x15xi1>, vector<128x15xf32>
    %49 = vector.shape_cast %48 : vector<128x15xf32> to vector<1x128x15xf32>
    %cst_9 = arith.constant dense<0.000000e+00> : vector<1xf32>
    %50 = vector.multi_reduction <add>, %49, %cst_9 [1, 2] : vector<1x128x15xf32> to vector<1xf32>
    %51 = vector.shape_cast %50 : vector<1xf32> to vector<1x1x1xf32>
    %52 = vector.extract %51[0, 0, 0] : f32 from vector<1x1x1xf32>
    %53 = tpu.iota {dimensions = array<i32: 1>} : vector<8x128xi32>
    %c0_i32_10 = arith.constant 0 : i32
    %54 = vector.broadcast %c0_i32_10 : i32 to vector<8x128xi32>
    %55 = arith.cmpi eq, %53, %54 : vector<8x128xi32>
    %c1_i32_11 = arith.constant 1 : i32
    %56 = vector.broadcast %c1_i32_11 : i32 to vector<8x128xi32>
    %57 = arith.cmpi eq, %53, %56 : vector<8x128xi32>
    %cst_12 = arith.constant 0.000000e+00 : f32
    %58 = vector.broadcast %52 : f32 to vector<8x128xf32>
    %59 = vector.broadcast %cst_12 : f32 to vector<8x128xf32>
    %60 = arith.select %57, %58, %59 : vector<8x128xi1>, vector<8x128xf32>
    %61 = vector.broadcast %38 : f32 to vector<8x128xf32>
    %62 = arith.select %55, %61, %60 : vector<8x128xi1>, vector<8x128xf32>
    %c0_13 = arith.constant 0 : index
    %c0_14 = arith.constant 0 : index
    %c0_15 = arith.constant 0 : index
    %63 = vector.load %arg2[%c0_13, %c0_14, %c0_15] : memref<1x8x128xf32, #tpu.memory_space<vmem>>, vector<1x8x128xf32>
    %64 = vector.shape_cast %63 : vector<1x8x128xf32> to vector<8x128xf32>
    %65 = vector.shape_cast %62 : vector<8x128xf32> to vector<1x8x128xf32>
    tpu.vector_store %arg2[%c0_13, %c0_14, %c0_15], %65 {strides = array<i32>} : memref<1x8x128xf32, #tpu.memory_space<vmem>>, vector<1x8x128xf32>,
    return
  }
  func.func @transform_0(%arg0: i32) -> (i32, i32) {
    %c0_i32 = arith.constant 0 : i32
    %c0_i32_0 = arith.constant 0 : i32
    return %arg0, %c0_i32 : i32, i32
  }
  func.func @transform_1(%arg0: i32) -> (i32, i32, i32) {
    %c0_i32 = arith.constant 0 : i32
    %c0_i32_0 = arith.constant 0 : i32
    %c0_i32_1 = arith.constant 0 : i32
    return %arg0, %c0_i32, %c0_i32_0 : i32, i32, i32
  }
}

</mosaic_0001>

<bundles_post_ra>
// kernel: tpu_custom_call.1
= control target key start
LH: loop header
LB: loop body
LE: loop exit
PB: predicated region body
PF: predicated region fallthrough
CT: control target
= control target key end

     0   :  { %s837_s10 = smov 1   ;;  %s1141_s0 = inlined_call_operand.vmem [shape: f32[128,16], index: 0, kind: input, shape index: {}]   ;;  %s1142_s1 = inlined_call_operand.hbm [shape: f32[1,8,128], index: 1, kind: output, shape index: {}]  }
   0x1   :  { %v853_v0 = vld [vmem:[%s1141_s0] sm:$0xff]  ;;  %v858_v1 = vld [vmem:[%s1141_s0 + $0x10] sm:$0xff]  ;;  %v867_v2 = vld [vmem:[%s1141_s0 + $0x8] sm:$0xff] }
   0x2   :  { %550 = vrot.lane.b32.xlu0 %v853_v0, %s837_s10  ;;  %554 = vrot.lane.b32.xlu1 %v858_v1, %s837_s10  ;;  %v872_v3 = vld [vmem:[%s1141_s0 + $0x18] sm:$0xff]  ;;  %v881_v4 = vld [vmem:[%s1141_s0 + $0x20] sm:$0xff] }
   0x3   :  { %v886_v5 = vld [vmem:[%s1141_s0 + $0x28] sm:$0xff] }
   0x6   :  { %552 = vrot.lane.b32.xlu0 %v867_v2, %s837_s10  ;;  %556 = vrot.lane.b32.xlu1 %v872_v3, %s837_s10 }
   0x7   :  { %6 = vsyncpa [#allocation3], 0  ;;  %v895_v6 = vld [vmem:[%s1141_s0 + $0x30] sm:$0xff]  ;;  %v900_v7 = vld [vmem:[%s1141_s0 + $0x38] sm:$0xff]  ;;  %v25_v16 = vlaneseq  ;;  %v80_v18 = vrot.slane %v858_v1, 7  ;;  %v78_v19 = vrot.slane %v867_v2, 7 }
   0x8   :  { %v909_v8 = vld [vmem:[%s1141_s0 + $0x40] sm:$0xff]  ;;  %v914_v9 = vld [vmem:[%s1141_s0 + $0x48] sm:$0xff]  ;;  %v923_v10 = vld [vmem:[%s1141_s0 + $0x50] sm:$0xff]  ;;  %vm76_vm0 = vcmask 1040384   ;;  %v77_v20 = vrot.slane %v853_v0, 7  ;;  %v82_v26 = vrot.slane %v872_v3, 7 }
   0x9   :  { %v928_v11 = vld [vmem:[%s1141_s0 + $0x58] sm:$0xff]  ;;  %v937_v12 = vld [vmem:[%s1141_s0 + $0x60] sm:$0xff]  ;;  %v942_v13 = vld [vmem:[%s1141_s0 + $0x68] sm:$0xff]  ;;  %v963_v17 = vshrl.u32 %v25_v16, 7  ;;  %v81_v22 = vsel %vm76_vm0, %v78_v19, %v80_v18  ;;  %v84_v29 = vrot.slane %v881_v4, 7  ;;  %v86_v41 = vrot.slane %v886_v5, 7 }
   0xa   :  { %558 = vrot.lane.b32.xlu0 %v881_v4, %s837_s10  ;;  %560 = vrot.lane.b32.xlu1 %v886_v5, %s837_s10  ;;  %v951_v14 = vld [vmem:[%s1141_s0 + $0x70] sm:$0xff]  ;;  %v956_v15 = vld [vmem:[%s1141_s0 + $0x78] sm:$0xff]  ;;  %v124_v23 = vsub.f32 %v853_v0, %v77_v20  ;;  %v126_v24 = vsub.f32 %v858_v1, %v81_v22  ;;  %v79_v25 = vsel %vm76_vm0, %v77_v20, %v78_v19  ;;  %v88_v43 = vrot.slane %v895_v6, 7  ;;  %s838_s0 = smov 127   ;;  %s839_s11 = smov [#allocation2]  }
   0xb   :  { %v28_v21 = vadd.s32 16, %v963_v17  ;;  %v144_v27 = vand.u32 15, %v963_v17  ;;  %v125_v30 = vsub.f32 %v867_v2, %v79_v25  ;;  %v83_v33 = vsel %vm76_vm0, %v80_v18, %v82_v26  ;;  %s798_s12 = sshll.u32 %s839_s11, 4  ;;  %s799_s12 = int_to_ptr.vmem [resolvable:$true] %s798_s12 }
   0xc   :  { %v380_v31 = vmul.f32 %v124_v23, %v124_v23  ;;  %v382_v32 = vmul.f32 %v126_v24, %v126_v24  ;;  %v30_v34 = vadd.s32 32, %v963_v17  ;;  %v85_v35 = vsel %vm76_vm0, %v82_v26, %v84_v29  ;;  %s813_s14 = scalar_lea.vmem %s799_s12, 128  ;;  %p818_p1 = scmp.lt.s32.totalorder %s799_s12, %s799_s12 }
   0xd   :  { %v158_v28 = vand.u32 15, %v28_v21  ;;  %vm332_vm1 = vcmp.ne.s32.totalorder %v144_v27, 0  ;;  %v381_v36 = vmul.f32 %v125_v30, %v125_v30  ;;  %v127_v37 = vsub.f32 %v872_v3, %v83_v33  ;;  %p814_p0 = scmp.ne.s32.totalorder %s799_s12, %s813_s14  ;;  %p819_p2 = scmp.lt.s32.totalorder %s813_s14, %s813_s14 }
   0xe   :  { %562 = vrot.lane.b32.xlu0 %v895_v6, %s837_s10  ;;  %564 = vrot.lane.b32.xlu1 %v900_v7, %s837_s10  ;;  %v428_v38 = vsel %vm332_vm1, %v380_v31, 0.0  ;;  %v128_v40 = vsub.f32 %v881_v4, %v85_v35  ;;  %v172_v42 = vand.u32 15, %v30_v34  ;;  %vm460_vm3 = vcmask 1046528  }
   0xf   :  { %vm334_vm2 = vcmp.ne.s32.totalorder %v158_v28, 0  ;;  %v461_v44 = vrot.slane %v428_v38, 1  ;;  %v462_v46 = vrot.slane %v381_v36, 1  ;;  %v383_v47 = vmul.f32 %v127_v37, %v127_v37  ;;  %p820_p3 = por %p819_p2, %p818_p1 }
  0x10   :  { %v430_v39 = vsel %vm334_vm2, %v382_v32, 0.0  ;;  %v384_v48 = vmul.f32 %v128_v40, %v128_v40  ;;  %v87_v49 = vsel %vm76_vm0, %v84_v29, %v86_v41  ;;  %vm985_vm4 = vcmp.ne.s32.totalorder %v172_v42, 0 }
  0x11   :  { %v464_v45 = vrot.slane %v430_v39, 1  ;;  %v32_v51 = vadd.s32 48, %v963_v17  ;;  %v89_v52 = vsel %vm76_vm0, %v86_v41, %v88_v43  ;;  %vm508_vm5 = vcmask 130048   ;;  %p821_p4 = pnand %p820_p3, %p814_p0 }
  0x12   :  { %566 = vrot.lane.b32.xlu0 %v909_v8, %s837_s10  ;;  %568 = vrot.lane.b32.xlu1 %v914_v9, %s837_s10  ;;  %v463_v53 = vsel %vm460_vm3, %v461_v44, %v462_v46  ;;  %v466_v55 = vrot.slane %v383_v47, 1  ;;  %v129_v56 = vsub.f32 %v886_v5, %v87_v49  ;;  %v432_v57 = vsel %vm985_vm4, %v384_v48, 0.0 }
  0x13   :  { %v465_v54 = vsel %vm460_vm3, %v462_v46, %v464_v45  ;;  %v130_v58 = vsub.f32 %v895_v6, %v89_v52  ;;  %v90_v59 = vrot.slane %v900_v7, 7  ;;  %v186_v60 = vand.u32 15, %v32_v51 }
  0x14   :  { %v92_v61 = vrot.slane %v909_v8, 7  ;;  %v509_v18 = vsel %vm508_vm5, %v463_v53, 0.0  ;;  %v510_v19 = vsel %vm508_vm5, %v465_v54, 0.0  ;;  %v467_v22 = vsel %vm460_vm3, %v464_v45, %v466_v55 }
  0x15   :  { %v468_v23 = vrot.slane %v432_v57, 1  ;;  %v385_v24 = vmul.f32 %v129_v56, %v129_v56  ;;  %v386_v25 = vmul.f32 %v130_v58, %v130_v58  ;;  %v91_v26 = vsel %vm76_vm0, %v88_v43, %v90_v59 }
  0x16   :  { %570 = vrot.lane.b32.xlu0 %v923_v10, %s837_s10  ;;  %572 = vrot.lane.b32.xlu1 %v928_v11, %s837_s10  ;;  %v511_v28 = vadd.f32 %v510_v19, %v509_v18  ;;  %vm1005_vm6 = vcmp.ne.s32.totalorder %v186_v60, 0  ;;  %v34_v30 = vadd.s32 64, %v963_v17  ;;  %v93_v31 = vsel %vm76_vm0, %v90_v59, %v92_v61 }
  0x17   :  { %v469_v36 = vsel %vm460_vm3, %v466_v55, %v468_v23  ;;  %v470_v37 = vrot.slane %v385_v24, 1  ;;  %v131_v38 = vsub.f32 %v900_v7, %v91_v26  ;;  %v434_v39 = vsel %vm1005_vm6, %v386_v25, 0.0 }
  0x18   :  { %v132_v40 = vsub.f32 %v909_v8, %v93_v31  ;;  %v94_v41 = vrot.slane %v914_v9, 7  ;;  %v96_v44 = vrot.slane %v923_v10, 7  ;;  %v472_v51 = vrot.slane %v434_v39, 1 }
  0x19   :  { %v471_v50 = vsel %vm460_vm3, %v468_v23, %v470_v37  ;;  %v387_v52 = vmul.f32 %v131_v38, %v131_v38  ;;  %v36_v58 = vadd.s32 80, %v963_v17  ;;  %v98_v23 = vrot.slane %v928_v11, 7 }
  0x1a   :  { %574 = vrot.lane.b32.xlu0 %v937_v12, %s837_s10  ;;  %576 = vrot.lane.b32.xlu1 %v942_v13, %s837_s10  ;;  %v388_v53 = vmul.f32 %v132_v40, %v132_v40  ;;  %v95_v54 = vsel %vm76_vm0, %v92_v61, %v94_v41  ;;  %v97_v59 = vsel %vm76_vm0, %v94_v41, %v96_v44  ;;  %v38_v38 = vadd.s32 96, %v963_v17 }
  0x1b   :  { %v473_v18 = vsel %vm460_vm3, %v470_v37, %v472_v51  ;;  %v474_v19 = vrot.slane %v387_v52, 1  ;;  %v214_v26 = vand.u32 15, %v36_v58  ;;  %vm538_vm11 = vcmask 129024  }
  0x1c   :  { %vm742_vm12 = vcmask 121856  }
  0x1d   :  { %vm1054_vm8 = vcmp.ne.s32.totalorder %v214_v26, 0 }
  0x1e   :  { %578 = vrot.lane.b32.xlu0 %v951_v14, %s837_s10  ;;  %580 = vrot.lane.b32.xlu1 %v956_v15, %s837_s10 }
  0x74   :  { %v551_v62 = vpop.permute.xlu0 %550  ;;  %v555_v63 = vpop.permute.xlu1 %554 }
  0x75   :  { %v598_v20 = vsub.f32 %v853_v0, %v551_v62  ;;  %v600_v21 = vsub.f32 %v858_v1, %v555_v63  ;;  %v512_v1 = vsel %vm508_vm5, %v467_v22, 0.0  ;;  %v134_v22 = vsub.f32 %v923_v10, %v97_v59 }
  0x76   :  { %v513_v43 = vadd.f32 %v512_v1, %v511_v28 }
  0x77   :  { %v614_v27 = vmul.f32 %v598_v20, %v598_v20  ;;  %v616_v33 = vmul.f32 %v600_v21, %v600_v21  ;;  %v133_v20 = vsub.f32 %v914_v9, %v95_v54 }
  0x78   :  { %v553_v0 = vpop.permute.xlu0 %552  ;;  %v557_v32 = vpop.permute.xlu1 %556 }
  0x79   :  { %v599_v34 = vsub.f32 %v867_v2, %v553_v0  ;;  %694 = vrot.lane.b32.xlu0 %v614_v27, %s838_s0  ;;  %v601_v35 = vsub.f32 %v872_v3, %v557_v32  ;;  %v200_v2 = vand.u32 15, %v34_v30  ;;  %v514_v3 = vsel %vm508_vm5, %v469_v36, 0.0 }
  0x7a   :  { %v515_v56 = vadd.f32 %v514_v3, %v513_v43  ;;  %v475_v0 = vsel %vm460_vm3, %v472_v51, %v474_v19  ;;  %v389_v1 = vmul.f32 %v133_v20, %v133_v20 }
  0x7b   :  { %v615_v42 = vmul.f32 %v599_v34, %v599_v34  ;;  %v617_v47 = vmul.f32 %v601_v35, %v601_v35  ;;  %vm1029_vm7 = vcmp.ne.s32.totalorder %v200_v2, 0  ;;  %v99_v34 = vsel %vm76_vm0, %v96_v44, %v98_v23 }
  0x7c   :  { %v559_v45 = vpop.permute.xlu0 %558  ;;  %v561_v46 = vpop.permute.xlu1 %560  ;;  %v436_v21 = vsel %vm1029_vm7, %v388_v53, 0.0  ;;  %v478_v44 = vrot.slane %v389_v1, 1 }
  0x7d   :  { %698 = vrot.lane.b32.xlu0 %v616_v33, %s838_s0  ;;  %696 = vrot.lane.b32.xlu1 %v615_v42, %s838_s0  ;;  %v602_v48 = vsub.f32 %v881_v4, %v559_v45  ;;  %v603_v49 = vsub.f32 %v886_v5, %v561_v46  ;;  %v516_v5 = vsel %vm508_vm5, %v471_v50, 0.0  ;;  %v476_v32 = vrot.slane %v436_v21, 1 }
  0x7e   :  { %v517_v25 = vadd.f32 %v516_v5, %v515_v56  ;;  %v390_v33 = vmul.f32 %v134_v22, %v134_v22  ;;  %v135_v45 = vsub.f32 %v928_v11, %v99_v34  ;;  %v228_v50 = vand.u32 15, %v38_v38 }
  0x7f   :  { %v618_v55 = vmul.f32 %v602_v48, %v602_v48  ;;  %v619_v62 = vmul.f32 %v603_v49, %v603_v49  ;;  %v477_v2 = vsel %vm460_vm3, %v474_v19, %v476_v32  ;;  %v479_v56 = vsel %vm460_vm3, %v476_v32, %v478_v44 }
  0x80   :  { %v563_v4 = vpop.permute.xlu0 %562  ;;  %v565_v60 = vpop.permute.xlu1 %564  ;;  %v438_v46 = vsel %vm1054_vm8, %v390_v33, 0.0  ;;  %v522_v53 = vsel %vm508_vm5, %v477_v2, 0.0  ;;  %v391_v58 = vmul.f32 %v135_v45, %v135_v45  ;;  %vm1079_vm9 = vcmp.ne.s32.totalorder %v228_v50, 0 }
  0x81   :  { %700 = vrot.lane.b32.xlu1 %v617_v47, %s838_s0  ;;  %v604_v63 = vsub.f32 %v895_v6, %v563_v4  ;;  %702 = vrot.lane.b32.xlu0 %v618_v55, %s838_s0  ;;  %v605_v61 = vsub.f32 %v900_v7, %v565_v60  ;;  %v100_v6 = vrot.slane %v937_v12, 7  ;;  %v518_v7 = vsel %vm508_vm5, %v473_v18, 0.0 }
  0x82   :  { %v519_v36 = vadd.f32 %v518_v7, %v517_v25  ;;  %v102_v47 = vrot.slane %v942_v13, 7  ;;  %v480_v57 = vrot.slane %v438_v46, 1  ;;  %v524_v18 = vsel %vm508_vm5, %v479_v56, 0.0 }
  0x83   :  { %v620_v24 = vmul.f32 %v604_v63, %v604_v63  ;;  %v621_v29 = vmul.f32 %v605_v61, %v605_v61  ;;  %v40_v63 = vadd.s32 112, %v963_v17 }
  0x84   :  { %v567_v27 = vpop.permute.xlu0 %566  ;;  %v569_v28 = vpop.permute.xlu1 %568  ;;  %v103_v4 = vsel %vm76_vm0, %v100_v6, %v102_v47  ;;  %v481_v22 = vsel %vm460_vm3, %v478_v44, %v480_v57 }
  0x85   :  { %704 = vrot.lane.b32.xlu1 %v619_v62, %s838_s0  ;;  %v606_v30 = vsub.f32 %v909_v8, %v567_v27  ;;  %706 = vrot.lane.b32.xlu0 %v620_v24, %s838_s0  ;;  %v607_v31 = vsub.f32 %v914_v9, %v569_v28  ;;  %v101_v8 = vsel %vm76_vm0, %v98_v23, %v100_v6  ;;  %v520_v9 = vsel %vm508_vm5, %v475_v0, 0.0 }
  0x86   :  { %v136_v3 = vsub.f32 %v937_v12, %v101_v8  ;;  %v521_v49 = vadd.f32 %v520_v9, %v519_v36  ;;  %v482_v23 = vrot.slane %v391_v58, 1  ;;  %v137_v24 = vsub.f32 %v942_v13, %v103_v4 }
  0x87   :  { %v622_v35 = vmul.f32 %v606_v30, %v606_v30  ;;  %v623_v41 = vmul.f32 %v607_v31, %v607_v31  ;;  %v106_v6 = vrot.slane %v956_v15, 7  ;;  %v242_v7 = vand.u32 15, %v40_v63 }
  0x88   :  { %v571_v39 = vpop.permute.xlu0 %570  ;;  %v573_v40 = vpop.permute.xlu1 %572  ;;  %v392_v59 = vmul.f32 %v136_v3, %v136_v3  ;;  %v523_v5 = vadd.f32 %v522_v53, %v521_v49  ;;  %v526_v30 = vsel %vm508_vm5, %v481_v22, 0.0  ;;  %v393_v0 = vmul.f32 %v137_v24, %v137_v24 }
  0x89   :  { %708 = vrot.lane.b32.xlu1 %v621_v29, %s838_s0  ;;  %v608_v42 = vsub.f32 %v923_v10, %v571_v39  ;;  %710 = vrot.lane.b32.xlu0 %v622_v35, %s838_s0  ;;  %v609_v43 = vsub.f32 %v928_v11, %v573_v40  ;;  %v104_v10 = vrot.slane %v951_v14, 7  ;;  %vm346_vm10 = vcmp.ne.s32.totalorder %v242_v7, 0 }
  0x8a   :  { %v440_v25 = vsel %vm1079_vm9, %v392_v59, 0.0  ;;  %v525_v28 = vadd.f32 %v524_v18, %v523_v5  ;;  %v486_v34 = vrot.slane %v393_v0, 1 }
  0x8b   :  { %v624_v48 = vmul.f32 %v608_v42, %v608_v42  ;;  %v625_v54 = vmul.f32 %v609_v43, %v609_v43  ;;  %v484_v31 = vrot.slane %v440_v25, 1  ;;  %v107_v1 = vsel %vm76_vm0, %v104_v10, %v106_v6 }
  0x8c   :  { %v575_v51 = vpop.permute.xlu0 %574  ;;  %v577_v52 = vpop.permute.xlu1 %576  ;;  %v139_v35 = vsub.f32 %v956_v15, %v107_v1 }
  0x8d   :  { %712 = vrot.lane.b32.xlu1 %v623_v41, %s838_s0  ;;  %v610_v11 = vsub.f32 %v937_v12, %v575_v51  ;;  %714 = vrot.lane.b32.xlu0 %v624_v48, %s838_s0  ;;  %v611_v55 = vsub.f32 %v942_v13, %v577_v52  ;;  %v105_v12 = vsel %vm76_vm0, %v102_v47, %v104_v10 }
  0x8e   :  { %v138_v26 = vsub.f32 %v951_v14, %v105_v12  ;;  %v483_v13 = vsel %vm460_vm3, %v480_v57, %v482_v23  ;;  %v485_v36 = vsel %vm460_vm3, %v482_v23, %v484_v31  ;;  %v395_v39 = vmul.f32 %v139_v35, %v139_v35 }
  0x8f   :  { %v626_v60 = vmul.f32 %v610_v11, %v610_v11  ;;  %v627_v19 = vmul.f32 %v611_v55, %v611_v55  ;;  %v528_v33 = vsel %vm508_vm5, %v483_v13, 0.0  ;;  %v530_v8 = vsel %vm508_vm5, %v485_v36, 0.0 }
  0x90   :  { %v579_v61 = vpop.permute.xlu0 %578  ;;  %v581_v21 = vpop.permute.xlu1 %580  ;;  %v394_v32 = vmul.f32 %v138_v26, %v138_v26  ;;  %v487_v40 = vsel %vm460_vm3, %v484_v31, %v486_v34  ;;  %v490_v2 = vrot.slane %v395_v39, 1 }
  0x91   :  { %716 = vrot.lane.b32.xlu1 %v625_v54, %s838_s0  ;;  %v612_v20 = vsub.f32 %v951_v14, %v579_v61  ;;  %718 = vrot.lane.b32.xlu0 %v626_v60, %s838_s0  ;;  %v613_v17 = vsub.f32 %v956_v15, %v581_v21  ;;  %v527_v14 = vadd.f32 %v526_v30, %v525_v28  ;;  %v532_v42 = vsel %vm508_vm5, %v487_v40, 0.0 }
  0x92   :  { %v442_v37 = vsel %vm346_vm10, %v394_v32, 0.0  ;;  %v539_v48 = vsel %vm538_vm11, %v490_v2, 0.0 }
  0x93   :  { %v628_v27 = vmul.f32 %v612_v20, %v612_v20  ;;  %v629_v29 = vmul.f32 %v613_v17, %v613_v17  ;;  %v529_v38 = vadd.f32 %v528_v33, %v527_v14  ;;  %v488_v9 = vrot.slane %v442_v37, 1 }
  0x95   :  { %720 = vrot.lane.b32.xlu1 %v627_v19, %s838_s0  ;;  %722 = vrot.lane.b32.xlu0 %v628_v27, %s838_s0  ;;  %v531_v41 = vadd.f32 %v530_v8, %v529_v38  ;;  %v489_v43 = vsel %vm460_vm3, %v486_v34, %v488_v9  ;;  %v491_v15 = vsel %vm460_vm3, %v488_v9, %v490_v2 }
  0x96   :  { %v534_v45 = vsel %vm508_vm5, %v489_v43, 0.0  ;;  %v536_v3 = vsel %vm508_vm5, %v491_v15, 0.0 }
  0x97   :  { %v533_v44 = vadd.f32 %v532_v42, %v531_v41 }
  0x99   :  { %724 = vrot.lane.b32.xlu1 %v629_v29, %s838_s0  ;;  %v535_v46 = vadd.f32 %v534_v45, %v533_v44 }
  0x9b   :  { %v537_v47 = vadd.f32 %v536_v3, %v535_v46 }
  0x9d   :  { %v540_v49 = vadd.f32 %v539_v48, %v537_v47  ;;  %v784_v48 = vand.u32 127, %v25_v16 }
  0x9f   :  { %vm786_vm13 = vcmp.eq.s32.totalorder %v784_v48, 1  ;;  %vm785_vm14 = vcmp.eq.s32.totalorder %v784_v48, 0 }
  0xb4   :  { %541 = vadd.xlane.f32.xlu0 %v540_v49 }
  0xeb   :  { %v695_v50 = vpop.permute.xlu0 %694 }
  0xec   :  { %v743_v52 = vsel %vm742_vm12, %v695_v50, 0.0 }
  0xef   :  { %v697_v10 = vpop.permute.xlu1 %696  ;;  %v699_v51 = vpop.permute.xlu0 %698 }
  0xf0   :  { %v744_v53 = vsel %vm742_vm12, %v697_v10, 0.0  ;;  %v746_v11 = vsel %vm742_vm12, %v699_v51, 0.0 }
  0xf1   :  { %v745_v54 = vadd.f32 %v744_v53, %v743_v52 }
  0xf3   :  { %v747_v55 = vadd.f32 %v746_v11, %v745_v54  ;;  %v701_v56 = vpop.permute.xlu1 %700  ;;  %v703_v57 = vpop.permute.xlu0 %702 }
  0xf4   :  { %v748_v58 = vsel %vm742_vm12, %v701_v56, 0.0  ;;  %v750_v59 = vsel %vm742_vm12, %v703_v57, 0.0 }
  0xf5   :  { %v749_v4 = vadd.f32 %v748_v58, %v747_v55 }
  0xf7   :  { %v751_v60 = vadd.f32 %v750_v59, %v749_v4  ;;  %v705_v5 = vpop.permute.xlu1 %704  ;;  %v707_v62 = vpop.permute.xlu0 %706 }
  0xf8   :  { %v752_v63 = vsel %vm742_vm12, %v705_v5, 0.0  ;;  %v754_v12 = vsel %vm742_vm12, %v707_v62, 0.0 }
  0xf9   :  { %v753_v61 = vadd.f32 %v752_v63, %v751_v60 }
  0xfb   :  { %v755_v18 = vadd.f32 %v754_v12, %v753_v61  ;;  %v709_v19 = vpop.permute.xlu1 %708  ;;  %v711_v20 = vpop.permute.xlu0 %710 }
  0xfc   :  { %v756_v21 = vsel %vm742_vm12, %v709_v19, 0.0  ;;  %v758_v22 = vsel %vm742_vm12, %v711_v20, 0.0 }
  0xfd   :  { %v757_v23 = vadd.f32 %v756_v21, %v755_v18 }
  0xff   :  { %v759_v24 = vadd.f32 %v758_v22, %v757_v23  ;;  %v713_v17 = vpop.permute.xlu1 %712  ;;  %v715_v25 = vpop.permute.xlu0 %714 }
 0x100   :  { %v760_v26 = vsel %vm742_vm12, %v713_v17, 0.0  ;;  %v762_v6 = vsel %vm742_vm12, %v715_v25, 0.0 }
 0x101   :  { %v761_v27 = vadd.f32 %v760_v26, %v759_v24 }
 0x103   :  { %v763_v28 = vadd.f32 %v762_v6, %v761_v27  ;;  %v717_v7 = vpop.permute.xlu1 %716  ;;  %v719_v29 = vpop.permute.xlu0 %718 }
 0x104   :  { %v764_v30 = vsel %vm742_vm12, %v717_v7, 0.0  ;;  %v766_v13 = vsel %vm742_vm12, %v719_v29, 0.0 }
 0x105   :  { %v765_v31 = vadd.f32 %v764_v30, %v763_v28 }
 0x107   :  { %v767_v0 = vadd.f32 %v766_v13, %v765_v31  ;;  %v721_v32 = vpop.permute.xlu1 %720  ;;  %v723_v1 = vpop.permute.xlu0 %722 }
 0x108   :  { %v768_v14 = vsel %vm742_vm12, %v721_v32, 0.0  ;;  %v770_v33 = vsel %vm742_vm12, %v723_v1, 0.0 }
 0x109   :  { %v769_v34 = vadd.f32 %v768_v14, %v767_v0 }
 0x10b   :  { %v771_v35 = vadd.f32 %v770_v33, %v769_v34  ;;  %v725_v36 = vpop.permute.xlu1 %724 }
 0x10c   :  { %v772_v37 = vsel %vm742_vm12, %v725_v36, 0.0 }
 0x10d   :  { %v773_v38 = vadd.f32 %v772_v37, %v771_v35 }
 0x10f   :  { %774 = vadd.xlane.f32.xlu1 %v773_v38 }
 0x141   :  { %v542_v8 = vpop.xlane.xlu0 %541 }
 0x142   :  { %v543_v39 = vrot.slane %v542_v8, 4 }
 0x144   :  { %v544_v40 = vadd.f32 %v543_v39, %v542_v8 }
 0x146   :  { %v545_v9 = vrot.slane %v544_v40, 2 }
 0x148   :  { %v546_v41 = vadd.f32 %v545_v9, %v544_v40 }
 0x14a   :  { %v547_v42 = vrot.slane %v546_v41, 1 }
 0x14c   :  { %v548_v43 = vadd.f32 %v547_v42, %v546_v41 }
 0x14e   :  { %806 = vpush %v548_v43 }
 0x17f   :  { %s807_s10 = spop %806 }
 0x180   :  { %v789_v50 = vstv %s807_s10 }
 0x19c   :  { %v775_v2 = vpop.xlane.xlu1 %774 }
 0x19d   :  { %v776_v44 = vrot.slane %v775_v2, 4 }
 0x19f   :  { %v777_v45 = vadd.f32 %v776_v44, %v775_v2 }
 0x1a1   :  { %v778_v15 = vrot.slane %v777_v45, 2 }
 0x1a3   :  { %v779_v46 = vadd.f32 %v778_v15, %v777_v45 }
 0x1a5   :  { %v780_v3 = vrot.slane %v779_v46, 1 }
 0x1a7   :  { %v781_v47 = vadd.f32 %v780_v3, %v779_v46 }
 0x1a9   :  { %808 = vpush %v781_v47 }
 0x1da   :  { %s809_s13 = spop %808 }
 0x1db   :  { %v787_v49 = vstv %s809_s13 }
 0x1dc   :  { %v788_v10 = vsel %vm786_vm13, %v787_v49, 0.0 }
 0x1dd   :  { %v790_v51 = vsel %vm785_vm14, %v789_v50, %v788_v10 }
 0x1de   :  { %791 = vst [vmem:[#allocation2] sm:$0xff] %v790_v51 }
 0x1df   :  { %824 = shalt.err (!%p821_p4)
}
 0x1e0   :  { %s825_s17 = scalar_lea.hbm %s1142_s1, 128 }
 0x1e1   :  { %p826_p5 = scmp.ne.s32.totalorder %s1142_s1, %s825_s17  ;;  %p829_p6 = scmp.lt.u32.totalorder %s825_s17, %s1142_s1 }
 0x1e3   :  { %p831_p7 = pnand %p829_p6, %p826_p5 }
 0x1e5   :  { %834 = shalt.err (!%p831_p7)
}
 0x1e6   :  { %801 = dma.vmem_to_hbm [thread:$0]  %s799_s12, 128, %s1142_s1, [#allocation3]  }
 0x1e7   :  { %835 = dma.done.wait [#allocation3], 128  }
 0x1e8   :  { %836 = vsyncadd [#allocation3], 4294967168 }
 0x1e9   :  { %805 = vsyncpa [#allocation3], 1 }

</bundles_post_ra>
